<compile_context>
chip_gen: v7x
topology: tpu7x:2x2x1
jax: 0.10.0
libtpu: 0.0.40
codegen_flags: <defaults>
</compile_context>

<pallas_src>
import jax
import jax.numpy as jnp
from jax.experimental import pallas as pl
from jax.experimental.pallas import tpu as pltpu


def _discriminator_kernel(xT_ref, w1T_ref, b1_ref, w2r_ref, b2_ref, o_ref):
    # xT: (4, TB)  w1T: (32, 4)  b1: (32, 1)  w2r: (1, 32)  b2 (SMEM): (1, 1)
    # o : (1, TB)

    # Linear(4, 32) on the MXU.  K=4 is MXU-inefficient, but the MXU is 100%
    # idle in this kernel and this removes the broadcast-FMA work from the
    # VALU, which was the binding slot.
    h = jnp.dot(w1T_ref[...], xT_ref[...],
                preferred_element_type=jnp.float32) + b1_ref[...]      # (32, TB)

    # LeakyReLU(negative_slope=0.02): mul + max (cheaper than mul+cmp+select).
    h = jnp.maximum(h, 0.02 * h)

    # Linear(32, 1) also on the MXU: (1,32) @ (32,TB) -> (1,TB); scalar bias
    # read from SMEM.
    z = jnp.dot(w2r_ref[...], h,
                preferred_element_type=jnp.float32) + b2_ref[0, 0]     # (1, TB)

    # Numerically stable, exact sigmoid (no approx reciprocal: its ~1e-3
    # error is not worth the negligible saving on a (1, TB) row).
    e = jnp.exp(-jnp.abs(z))
    inv = 1.0 / (1.0 + e)
    o_ref[...] = jnp.where(z >= 0.0, inv, e * inv)


def _round_up(n, m):
    return -(-n // m) * m


def discriminator_forward(x, w1, b1, w2, b2, *, block_b=65536):
    """x: (B, 4) f32.  Returns (B, 1) f32 — same semantics as the PyTorch module."""
    B, F = x.shape
    H = w1.shape[1]

    # ---- batch-tile selection -------------------------------------------
    # Lane-dense tiles, multiple of 256.  Large tiles amortize the per-step
    # pipeline overhead; for moderate B cap TB at ~B/2 so the "parallel" grid
    # axis has >= 2 steps (both v7x TensorCores busy).
    block_b = max(256, _round_up(block_b, 256))
    TB = min(block_b, _round_up(B, 256))
    if B > 512:
        TB = min(TB, _round_up(-(-B // 2), 256))
    TB = max(TB, 256)
    B_pad = _round_up(B, TB)

    # TODO(synk): ideally activations arrive already in (4, B) layout from the
    # producer; the pad+cast+transpose below is an extra HBM pass otherwise.
    xT = jnp.pad(x.astype(jnp.float32), ((0, B_pad - B), (0, 0))).T    # (4, B_pad)
    w1T = w1.astype(jnp.float32).T                                     # (32, 4)
    b1c = b1.astype(jnp.float32).reshape(H, 1)                         # (32, 1)
    w2r = w2.astype(jnp.float32).reshape(1, H)                         # (1, 32)
    b2s = b2.astype(jnp.float32).reshape(1, 1)                         # (1, 1) -> SMEM

    oT = pl.pallas_call(
        _discriminator_kernel,
        out_shape=jax.ShapeDtypeStruct((1, B_pad), jnp.float32),
        grid_spec=pl.GridSpec(
            grid=(B_pad // TB,),
            in_specs=[
                pl.BlockSpec((F, TB), lambda i: (0, i)),     # x tile, batch on lanes
                pl.BlockSpec((H, F), lambda i: (0, 0)),      # W1^T resident
                pl.BlockSpec((H, 1), lambda i: (0, 0)),      # b1 resident
                pl.BlockSpec((1, H), lambda i: (0, 0)),      # W2 row resident
                pl.BlockSpec((1, 1), lambda i: (0, 0),
                             memory_space=pltpu.MemorySpace.SMEM),   # scalar b2
            ],
            out_specs=pl.BlockSpec((1, TB), lambda i: (0, i)),
        ),
        compiler_params=pltpu.CompilerParams(
            dimension_semantics=("parallel",),   # batch axis -> both TCs on v7x
            # Sublane padding makes the (4,TB)/(1,TB) tiles 32*TB bytes each in
            # VMEM; double-buffered I/O + the (32,TB) hidden activation needs
            # ~20-30 MiB at TB=64K.  48 MiB is above v5e's 16 MiB scoped
            # default and safely under v7x's 64 MiB physical VMEM.
            vmem_limit_bytes=48 * 1024 * 1024,
        ),
    )(xT, w1T, b1c, w2r, b2s)

    return oT.T[:B]   # back to (B, 1); cheap layout plumbing outside the kernel


def init_params(key):
    """Deterministic init mimicking nn.Linear's default U(-1/sqrt(fan_in), 1/sqrt(fan_in))."""
    k1, k2, k3, k4 = jax.random.split(key, 4)
    lim1 = 1.0 / jnp.sqrt(4.0)
    lim2 = 1.0 / jnp.sqrt(32.0)
    w1 = jax.random.uniform(k1, (4, 32), jnp.float32, -lim1, lim1)
    b1 = jax.random.uniform(k2, (32,), jnp.float32, -lim1, lim1)
    w2 = jax.random.uniform(k3, (32, 1), jnp.float32, -lim2, lim2)
    b2 = jax.random.uniform(k4, (1,), jnp.float32, -lim2, lim2)
    return w1, b1, w2, b2


def _reference(x, w1, b1, w2, b2):
    # Highest-precision reference so the comparison isn't polluted by XLA's
    # default (reduced-precision) f32 matmul on TPU.
    h = jnp.dot(x, w1, precision=jax.lax.Precision.HIGHEST) + b1
    h = jnp.where(h >= 0, h, 0.02 * h)
    z = jnp.dot(h, w2, precision=jax.lax.Precision.HIGHEST) + b2
    return jax.nn.sigmoid(z)


if __name__ == "__main__":
    # TODO(synk): MSELoss / Adam optimiser / train() backward step are training-loop
    # machinery, not part of the forward pass, and are not translated here.
    key = jax.random.PRNGKey(0)
    k_in, k_params, k_in2 = jax.random.split(key, 3)

    w1, b1, w2, b2 = init_params(k_params)

    # Small case (B=8): single grid step, batch padded to one 256-lane tile.
    batch = 8
    x = jax.random.normal(k_in, (batch, 4), jnp.float32)
    out = jax.block_until_ready(discriminator_forward(x, w1, b1, w2, b2))
    ref = _reference(x, w1, b1, w2, b2)
    assert out.shape == (batch, 1)
    # tolerance accommodates MXU f32-pass accuracy (kernel) vs HIGHEST ref
    assert jnp.allclose(out, ref, atol=2e-3, rtol=2e-3), "mismatch vs reference (B=8)"

    # Non-multiple batch exercising the multi-step parallel grid + padding path.
    batch2 = 300
    x2 = jax.random.normal(k_in2, (batch2, 4), jnp.float32)
    out2 = jax.block_until_ready(
        discriminator_forward(x2, w1, b1, w2, b2, block_b=256))   # grid=(2,)
    ref2 = _reference(x2, w1, b1, w2, b2)
    assert out2.shape == (batch2, 1)
    assert jnp.allclose(out2, ref2, atol=2e-3, rtol=2e-3), "mismatch vs reference (B=300)"

    print("KERNEL_OK")
</pallas_src>

<mosaic_0001>
module attributes {stable_mosaic.version = 11 : i64} {
  func.func @_discriminator_kernel(%arg0: i32, %arg1: memref<4x256xf32, #tpu.memory_space<vmem>>, %arg2: memref<32x4xf32, #tpu.memory_space<vmem>>, %arg3: memref<32x1xf32, #tpu.memory_space<vmem>>, %arg4: memref<1x32xf32, #tpu.memory_space<vmem>>, %arg5: memref<1x1xf32, #tpu.memory_space<smem>>, %arg6: memref<1x256xf32, #tpu.memory_space<vmem>>) attributes {dimension_semantics = [#tpu.dimension_semantics<parallel>], iteration_bounds = array<i64: 1>, scalar_prefetch = 0 : i64, scratch_operands = 0 : i64, tpu.core_type = #tpu.core_type<tc>, window_params = [{transform_indices = @transform_0, window_bounds = array<i64: 4, 256>}, {pipeline_mode = #tpu.pipeline_mode<synchronous>, transform_indices = @transform_1, window_bounds = array<i64: 32, 4>}, {pipeline_mode = #tpu.pipeline_mode<synchronous>, transform_indices = @transform_2, window_bounds = array<i64: 32, 1>}, {pipeline_mode = #tpu.pipeline_mode<synchronous>, transform_indices = @transform_3, window_bounds = array<i64: 1, 32>}, {transform_indices = @transform_4, window_bounds = array<i64: 1, 1>}, {transform_indices = @transform_5, window_bounds = array<i64: 1, 256>}]} {
    %c0 = arith.constant 0 : index
    %c0_0 = arith.constant 0 : index
    %0 = vector.load %arg2[%c0, %c0_0] : memref<32x4xf32, #tpu.memory_space<vmem>>, vector<32x4xf32>
    %c0_1 = arith.constant 0 : index
    %c0_2 = arith.constant 0 : index
    %1 = vector.load %arg1[%c0_1, %c0_2] : memref<4x256xf32, #tpu.memory_space<vmem>>, vector<4x256xf32>
    %cst = arith.constant dense<0.000000e+00> : vector<32x256xf32>
    %2 = tpu.matmul %0, %1, %cst {dimension_numbers = #tpu.dot_dimension_numbers<[1], [0], [0], [1], [0, 0, 1, 1], [], []>} : vector<32x4xf32>, vector<4x256xf32>, vector<32x256xf32> -> vector<32x256xf32>
    %c0_3 = arith.constant 0 : index
    %c0_4 = arith.constant 0 : index
    %3 = vector.load %arg3[%c0_3, %c0_4] : memref<32x1xf32, #tpu.memory_space<vmem>>, vector<32x1xf32>
    %4 = vector.broadcast %3 : vector<32x1xf32> to vector<32x256xf32>
    %5 = arith.addf %2, %4 : vector<32x256xf32>
    %cst_5 = arith.constant 2.000000e-02 : f32
    %6 = vector.broadcast %cst_5 : f32 to vector<32x256xf32>
    %7 = arith.mulf %6, %5 : vector<32x256xf32>
    %8 = arith.maximumf %5, %7 : vector<32x256xf32>
    %c0_6 = arith.constant 0 : index
    %c0_7 = arith.constant 0 : index
    %9 = vector.load %arg4[%c0_6, %c0_7] : memref<1x32xf32, #tpu.memory_space<vmem>>, vector<1x32xf32>
    %cst_8 = arith.constant dense<0.000000e+00> : vector<1x256xf32>
    %10 = tpu.matmul %9, %8, %cst_8 {dimension_numbers = #tpu.dot_dimension_numbers<[1], [0], [0], [1], [0, 0, 1, 1], [], []>} : vector<1x32xf32>, vector<32x256xf32>, vector<1x256xf32> -> vector<1x256xf32>
    %c0_9 = arith.constant 0 : index
    %c0_10 = arith.constant 0 : index
    %11 = memref.load %arg5[%c0_9, %c0_10] : memref<1x1xf32, #tpu.memory_space<smem>>
    %12 = vector.broadcast %11 : f32 to vector<1x256xf32>
    %13 = arith.addf %10, %12 : vector<1x256xf32>
    %14 = math.absf %13 : vector<1x256xf32>
    %cst_11 = arith.constant 0.000000e+00 : f32
    %15 = vector.broadcast %cst_11 : f32 to vector<1x256xf32>
    %16 = arith.subf %15, %14 : vector<1x256xf32>
    %17 = math.exp %16 : vector<1x256xf32>
    %cst_12 = arith.constant 1.000000e+00 : f32
    %18 = vector.broadcast %cst_12 : f32 to vector<1x256xf32>
    %19 = arith.addf %18, %17 : vector<1x256xf32>
    %cst_13 = arith.constant 1.000000e+00 : f32
    %20 = vector.broadcast %cst_13 : f32 to vector<1x256xf32>
    %21 = arith.divf %20, %19 : vector<1x256xf32>
    %cst_14 = arith.constant 0.000000e+00 : f32
    %22 = vector.broadcast %cst_14 : f32 to vector<1x256xf32>
    %23 = arith.cmpf oge, %13, %22 : vector<1x256xf32>
    %24 = arith.mulf %17, %21 : vector<1x256xf32>
    %25 = arith.select %23, %21, %24 : vector<1x256xi1>, vector<1x256xf32>
    %c0_15 = arith.constant 0 : index
    %c0_16 = arith.constant 0 : index
    %26 = vector.load %arg6[%c0_15, %c0_16] : memref<1x256xf32, #tpu.memory_space<vmem>>, vector<1x256xf32>
    tpu.vector_store %arg6[%c0_15, %c0_16], %25 {strides = array<i32>} : memref<1x256xf32, #tpu.memory_space<vmem>>, vector<1x256xf32>,
    return
  }
  func.func @transform_0(%arg0: i32) -> (i32, i32) {
    %c0_i32 = arith.constant 0 : i32
    %c0_i32_0 = arith.constant 0 : i32
    return %c0_i32, %arg0 : i32, i32
  }
  func.func @transform_1(%arg0: i32) -> (i32, i32) {
    %c0_i32 = arith.constant 0 : i32
    %c0_i32_0 = arith.constant 0 : i32
    %c0_i32_1 = arith.constant 0 : i32
    return %c0_i32, %c0_i32_0 : i32, i32
  }
  func.func @transform_2(%arg0: i32) -> (i32, i32) {
    %c0_i32 = arith.constant 0 : i32
    %c0_i32_0 = arith.constant 0 : i32
    %c0_i32_1 = arith.constant 0 : i32
    return %c0_i32, %c0_i32_0 : i32, i32
  }
  func.func @transform_3(%arg0: i32) -> (i32, i32) {
    %c0_i32 = arith.constant 0 : i32
    %c0_i32_0 = arith.constant 0 : i32
    %c0_i32_1 = arith.constant 0 : i32
    return %c0_i32, %c0_i32_0 : i32, i32
  }
  func.func @transform_4(%arg0: i32) -> (i32, i32) {
    %c0_i32 = arith.constant 0 : i32
    %c0_i32_0 = arith.constant 0 : i32
    %c0_i32_1 = arith.constant 0 : i32
    return %c0_i32, %c0_i32_0 : i32, i32
  }
  func.func @transform_5(%arg0: i32) -> (i32, i32) {
    %c0_i32 = arith.constant 0 : i32
    %c0_i32_0 = arith.constant 0 : i32
    return %c0_i32, %arg0 : i32, i32
  }
}

</mosaic_0001>

<bundles_post_ra>
// kernel: tpu_custom_call.1
= control target key start
LH: loop header
LB: loop body
LE: loop exit
PB: predicated region body
PF: predicated region fallthrough
CT: control target
= control target key end

     0   :  { %vm66_vm0 = vcmask 1043456   ;;  %v365_v2 = vmov 0.0   ;;  %vm53_vm1 = vcmask 31744   ;;  %v366_v5 = vmov 0   ;;  %s448_s0 = inlined_call_operand.vmem [shape: f32[4,256], index: 0, kind: input, shape index: {}]   ;;  %s449_s1 = inlined_call_operand.vmem [shape: f32[32,4], index: 1, kind: input, shape index: {}]   ;;  %s450_s2 = inlined_call_operand.vmem [shape: f32[32,1], index: 2, kind: input, shape index: {}]   ;;  %s451_s3 = inlined_call_operand.vmem [shape: f32[1,32], index: 3, kind: input, shape index: {}]   ;;  %s452_s4 = inlined_call_operand.<no memory space> [shape: f32[1,1], index: 4, kind: input, shape index: {}]   ;;  %s453_s5 = inlined_call_operand.hbm [shape: f32[1,256], index: 5, kind: output, shape index: {}]  }
   0x1   :  { %v26_v0 = vld [vmem:[%s448_s0] sm:$0xff]  ;;  %135 = vmatprep.mubr.f32.mxu0 %v365_v2  ;;  %247 = vmatprep.mubr.f32.mxu1 %v365_v2  ;;  %v29_v6 = vld [vmem:[%s450_s2 + $0x10] sm:$0xff] }
   0x2   :  { %v52_v1 = vcombine.high %v26_v0, %v26_v0  ;;  %v27_v3 = vld [vmem:[%s450_s2] sm:$0xff]  ;;  %330 = vset.pattern.permute.xlu0 %v366_v5  ;;  %331 = vset.pattern.permute.xlu1 %v366_v5 }
   0x3   :  { %v22_v4 = vld [vmem:[%s449_s1] sm:$0xff]  ;;  %33 = vperm.xlu0 %330, %v27_v3  }
   0x4   :  { %311 = vmatprep.subr.msk.mxu0 %vm66_vm0, %v52_v1 }
   0x5   :  { %11 = vsyncpa [#allocation4], 0  ;;  %312 = vmatpush1.msk.msra.mxu0 %vm66_vm0, %v26_v0  ;;  %v28_v7 = vld [vmem:[%s450_s2 + $0x8] sm:$0xff]  ;;  %43 = vperm.xlu1 %331, %v29_v6   ;;  %v30_v8 = vld [vmem:[%s450_s2 + $0x18] sm:$0xff]  ;;  %vm179_vm2 = vcmask 261120   ;;  %v178_v53 = vstv %s452_s4  ;;  %v280_v6 = vlaneseq }
   0x6   :  { %313 = vmatmul.mubr.msk.f32.vlgmr.msra.gmra.mrb[0].mxu0 %vm53_vm1, %v22_v4  ;;  %v23_v9 = vld [vmem:[%s449_s1 + $0x8] sm:$0xff]  ;;  %v24_v10 = vld [vmem:[%s449_s1 + $0x10] sm:$0xff]  ;;  %v25_v11 = vld [vmem:[%s449_s1 + $0x18] sm:$0xff]  ;;  %v367_v4 = vmov 1966171168  }
   0x7   :  { %141 = vmatprep.mubr.f32.mxu0 %v365_v2  ;;  %38 = vperm.xlu0 %330, %v28_v7   ;;  %v176_v52 = vld [vmem:[%s451_s3] sm:$0x1]  ;;  %v278_v5 = vunpack.c.l.s4 %v367_v4  ;;  %s368_s3 = smov [#allocation3]   ;;  %vm294_vm5 = vcmp.lt.s32.totalorder %v280_v6, 256 }
   0x8   :  { %s303_s4 = sshll.u32 %s368_s3, 4  ;;  %s304_s4 = int_to_ptr.vmem [resolvable:$true] %s303_s4 }
   0x9   :  { %48 = vperm.xlu1 %331, %v30_v8   ;;  %v279_v7 = vunpack.c.0.s8 %v278_v5  ;;  %v281_v8 = vshrl.u32 %v280_v6, 7  ;;  %s341_s12 = scalar_lea.vmem %s304_s4, 32  ;;  %p346_p1 = scmp.lt.s32.totalorder %s304_s4, %s304_s4 }
   0xa   :  { %314 = vmatmul.mubr.msk.f32.gmra.mrb[2].mxu0 %vm53_vm1, %v23_v9  ;;  %p342_p0 = scmp.ne.s32.totalorder %s304_s4, %s341_s12  ;;  %p347_p2 = scmp.lt.s32.totalorder %s341_s12, %s341_s12 }
   0xb   :  { %147 = vmatprep.mubr.f32.mxu0 %v365_v2 }
   0xc   :  { %p348_p3 = por %p347_p2, %p346_p1 }
   0xe   :  { %315 = vmatmul.mubr.msk.f32.gmra.mrb[4].mxu0 %vm53_vm1, %v24_v10  ;;  %p349_p4 = pnand %p348_p3, %p342_p0 }
   0xf   :  { %153 = vmatprep.mubr.f32.mxu0 %v365_v2 }
  0x12   :  { %316 = vmatmul.mubr.msk.f32.gmra.mrb[6].mxu0 %vm53_vm1, %v25_v11 }
  0x82   :  { %v34_v12 = vpop.permute.xlu0 %33 }
  0x84   :  { %v44_v23 = vpop.permute.xlu1 %43 }
  0x86   :  { %v39_v17 = vpop.permute.xlu0 %38 }
  0x88   :  { %v49_v36 = vpop.permute.xlu1 %48 }
  0xd9   :  { %v137_v13 = vpop.f32.mrb[0].mxu0 }
  0xda   :  { %v138_v14 = vadd.f32 %v137_v13, %v34_v12  ;;  %v139_v15 = vpop.f32.mrb[1].mxu0 }
  0xdb   :  { %v140_v16 = vadd.f32 %v139_v15, %v34_v12 }
  0xdc   :  { %v160_v19 = vmul.f32 0.02, %v138_v14 }
  0xdd   :  { %v143_v18 = vpop.f32.mrb[2].mxu0  ;;  %v161_v22 = vmul.f32 0.02, %v140_v16 }
  0xde   :  { %v144_v20 = vadd.f32 %v143_v18, %v39_v17  ;;  %v145_v21 = vpop.f32.mrb[3].mxu0  ;;  %v168_v28 = vmax.f32 %v138_v14, %v160_v19  ;;  %v282_v14 = vsub.s32 %v279_v7, %v281_v8 }
  0xdf   :  { %v146_v24 = vadd.f32 %v145_v21, %v39_v17  ;;  %v169_v33 = vmax.f32 %v140_v16, %v161_v22 }
  0xe0   :  { %v162_v25 = vmul.f32 0.02, %v144_v20 }
  0xe1   :  { %v163_v26 = vmul.f32 0.02, %v146_v24  ;;  %v149_v27 = vpop.f32.mrb[4].mxu0 }
  0xe2   :  { %v170_v29 = vmax.f32 %v144_v20, %v162_v25  ;;  %v150_v30 = vadd.f32 %v149_v27, %v44_v23  ;;  %v151_v31 = vpop.f32.mrb[5].mxu0 }
  0xe3   :  { %v152_v32 = vadd.f32 %v151_v31, %v44_v23  ;;  %v171_v34 = vmax.f32 %v146_v24, %v163_v26 }
  0xe4   :  { %v320_v35 = vpack.c.bf16 %v170_v29, %v168_v28  ;;  %v164_v39 = vmul.f32 0.02, %v150_v30 }
  0xe5   :  { %v155_v37 = vpop.f32.mrb[6].mxu0  ;;  %v318_v38 = vpack.c.bf16 %v171_v34, %v169_v33  ;;  %v165_v42 = vmul.f32 0.02, %v152_v32 }
  0xe6   :  { %v156_v40 = vadd.f32 %v155_v37, %v49_v36  ;;  %v157_v41 = vpop.f32.mrb[7].mxu0  ;;  %v172_v46 = vmax.f32 %v150_v30, %v164_v39 }
  0xe7   :  { %v158_v43 = vadd.f32 %v157_v41, %v49_v36  ;;  %319 = vmatprep.subr.bf16.mxu1 %v318_v38  ;;  %v173_v48 = vmax.f32 %v152_v32, %v165_v42 }
  0xe8   :  { %v166_v44 = vmul.f32 0.02, %v156_v40  ;;  %321 = vmatpush1.bf16.msra.mxu1 %v320_v35 }
  0xe9   :  { %v167_v45 = vmul.f32 0.02, %v158_v43 }
  0xea   :  { %v174_v47 = vmax.f32 %v156_v40, %v166_v44 }
  0xeb   :  { %v175_v49 = vmax.f32 %v158_v43, %v167_v45 }
  0xec   :  { %v324_v50 = vpack.c.bf16 %v174_v47, %v172_v46 }
  0xed   :  { %v322_v51 = vpack.c.bf16 %v175_v49, %v173_v48 }
  0xef   :  { %323 = vmatprep.subr.bf16.mxu1 %v322_v51 }
  0xf0   :  { %325 = vmatpush1.bf16.msra.mxu1 %v324_v50 }
  0xf3   :  { %317 = vmatmul.mubr.msk.f32.vlgmr.msra.gmra.mrb[0].mxu1 %vm179_vm2, %v176_v52 }
 0x1c6   :  { %v249_v54 = vpop.f32.mrb[0].mxu1 }
 0x1c7   :  { %v250_v55 = vadd.f32 %v249_v54, %v178_v53  ;;  %v251_v56 = vpop.f32.mrb[1].mxu1 }
 0x1c8   :  { %v252_v57 = vadd.f32 %v251_v56, %v178_v53 }
 0x1c9   :  { %v254_v58 = vand.u32 2147483647, %v250_v55  ;;  %vm268_vm3 = vcmp.ge.f32.partialorder %v250_v55, 0.0 }
 0x1ca   :  { %v255_v59 = vand.u32 2147483647, %v252_v57  ;;  %vm269_vm4 = vcmp.ge.f32.partialorder %v252_v57, 0.0 }
 0x1cb   :  { %v256_v60 = vsub.f32 0.0, %v254_v58 }
 0x1cc   :  { %v257_v61 = vsub.f32 0.0, %v255_v59 }
 0x1cd   :  { %v258_v62 = vmul.f32 1.442695, %v256_v60 }
 0x1ce   :  { %v260_v63 = vmul.f32 1.442695, %v257_v61 }
 0x1cf   :  { %333 = vpow2.f32 %v258_v62 }
 0x1d0   :  { %335 = vpow2.f32 %v260_v63 }
 0x1d9   :  { %v334_v0 = vpop.eup %333 }
 0x1da   :  { %v336_v1 = vpop.eup %335  ;;  %v262_v2 = vadd.f32 1.0, %v334_v0 }
 0x1db   :  { %v263_v3 = vadd.f32 1.0, %v336_v1 }
 0x1dc   :  { %337 = vrcp.f32 %v262_v2 }
 0x1dd   :  { %339 = vrcp.f32 %v263_v3 }
 0x1e6   :  { %v338_v9 = vpop.eup %337 }
 0x1e7   :  { %v340_v10 = vpop.eup %339  ;;  %v270_v11 = vmul.f32 %v338_v9, %v334_v0 }
 0x1e8   :  { %v271_v12 = vmul.f32 %v340_v10, %v336_v1 }
 0x1e9   :  { %v272_v13 = vsel %vm268_vm3, %v338_v9, %v270_v11 }
 0x1ea   :  { %v273_v15 = vsel %vm269_vm4, %v340_v10, %v271_v12 }
 0x1eb   :  { %v276_v16 = vcombine.low %v272_v13, %v273_v15 }
 0x1ed   :  { %v283_v17 = vrot.slane %v276_v16, %v282_v14 }
 0x1ef   :  { %v290_v18 = vrot.slane %v283_v17, %v282_v14 }
 0x1f1   :  { %296 = vst.msk [vmem:[#allocation3] sm:$0x3] %vm294_vm5, %v290_v18 }
 0x1f2   :  { %352 = shalt.err (!%p349_p4)
}
 0x1f3   :  { %s353_s15 = scalar_lea.hbm %s453_s5, 32 }
 0x1f4   :  { %p354_p5 = scmp.ne.s32.totalorder %s453_s5, %s353_s15  ;;  %p357_p6 = scmp.lt.u32.totalorder %s353_s15, %s453_s5 }
 0x1f6   :  { %p359_p7 = pnand %p357_p6, %p354_p5 }
 0x1f8   :  { %362 = shalt.err (!%p359_p7)
}
 0x1f9   :  { %306 = dma.vmem_to_hbm [thread:$0]  %s304_s4, 32, %s453_s5, [#allocation4]  }
 0x1fa   :  { %363 = dma.done.wait [#allocation4], 32  }
 0x1fb   :  { %364 = vsyncadd [#allocation4], 4294967264 }
 0x1fc   :  { %310 = vsyncpa [#allocation4], 1 }

</bundles_post_ra>
